<compile_context>
chip_gen: v7x
topology: tpu7x:2x2x1
jax: 0.10.0
libtpu: 0.0.40
codegen_flags: <defaults>
</compile_context>

<pallas_src>
import functools

import jax
import jax.numpy as jnp
from jax.experimental import pallas as pl
from jax.experimental.pallas import tpu as pltpu


def _col_to_row(col, s):
    """(S,1) column -> (1,S) row without a vector transpose.

    Lane-broadcast the column, mask to the diagonal, reduce over sublanes.
    Uses only iota/where/sum, which lower cleanly in Mosaic for any S.
    """
    i = jax.lax.broadcasted_iota(jnp.int32, (s, s), 0)
    j = jax.lax.broadcasted_iota(jnp.int32, (s, s), 1)
    diag = jnp.where(i == j, jnp.broadcast_to(col, (s, s)), 0.0)
    return jnp.sum(diag, axis=0, keepdims=True)            # (1, S)


def _tr_layer_kernel(hidden_ref, adj_ref, adjT_ref, alias_ref,
                     w1_ref, w2_ref, bias_ref, out_ref, *, tr_layer):
    s = adj_ref.shape[1]
    h = hidden_ref[0].astype(jnp.float32)                  # (S, H)
    adj = adj_ref[0].astype(jnp.float32)                   # (S, S)
    adjT = adjT_ref[0].astype(jnp.float32)                 # (S, S)
    w1 = w1_ref[...].astype(jnp.float32)                   # (1, H)
    w2 = w2_ref[...].astype(jnp.float32)                   # (1, H)
    bias = bias_ref[0, 0]                                  # scalar (SMEM)

    neg_big = jnp.float32(-9.0e15)
    # Loop-invariant masks (computed once, reused every layer).
    mask_out = adj == 1.0
    mask_in = adjT == 1.0
    mask_iso = (adj + adjT) == 0.0

    # tr_layer is a small compile-time constant -> static unroll.
    for _ in range(tr_layer):
        a1 = jnp.sum(h * w1, axis=1, keepdims=True)        # (S, 1) = h @ w1
        a2 = jnp.sum(h * w2, axis=1, keepdims=True)        # (S, 1) = h @ w2
        a1_row = _col_to_row(a1, s)                        # (1, S)
        a2_row = _col_to_row(a2, s)                        # (1, S)

        att_out = jnp.tanh(a1 + a2_row + bias)             # (S, S): tanh(a1[i]+a2[j]+b)
        att_in = jnp.tanh(a2 + a1_row + bias)              # == att_out^T (rebuilt, no transpose)
        alpha_out = jnp.where(mask_out, att_out, 0.0)
        alpha_in = jnp.where(mask_in, att_in, 0.0)         # == alpha_out^T
        alpha = 0.5 * (alpha_out + alpha_in)
        alpha = jnp.where(mask_iso, neg_big, alpha)

        # Row softmax along the lane (last) axis.
        m = jnp.max(alpha, axis=-1, keepdims=True)
        e = jnp.exp(alpha - m)
        probs = e / jnp.sum(e, axis=-1, keepdims=True)

        h = jnp.dot(probs, h, preferred_element_type=jnp.float32)   # (S, H), MXU

    # Alias gather: out[l, :] = h[alias[l], :], as a one-hot matmul on the MXU.
    alias_col = alias_ref[0]                               # (L, 1) int32
    l_len = alias_col.shape[0]
    cls = jax.lax.broadcasted_iota(jnp.int32, (l_len, s), 1)
    sel = (cls == alias_col).astype(jnp.float32)           # (L, S) one-hot rows
    out_ref[0] = jnp.dot(sel, h,
                         preferred_element_type=jnp.float32).astype(out_ref.dtype)


def tr_layer_forward(hidden, adj_out, alias_inputs, weight, bias, *, tr_layer):
    """Pallas forward of TRLayer.

    hidden:       (B, S, H) float
    adj_out:      (B, S, S) float (0/1 adjacency)
    alias_inputs: (B, L)    int
    weight:       (1, 2H)   torch nn.Linear(2H, 1).weight
    bias:         scalar    torch nn.Linear(2H, 1).bias
    returns:      (B, L, H)
    """
    b_sz, s_len, hsz = hidden.shape
    l_len = alias_inputs.shape[1]

    w = jnp.asarray(weight, jnp.float32).reshape(1, 2 * hsz)
    w1 = w[:, :hsz]                                        # (1, H)
    w2 = w[:, hsz:]                                        # (1, H)
    bias2 = jnp.asarray(bias, jnp.float32).reshape(1, 1)
    adjT = jnp.swapaxes(adj_out, -1, -2)                   # loop-invariant, once
    alias3 = alias_inputs.astype(jnp.int32).reshape(b_sz, l_len, 1)

    # TODO(synk): for very large S (per-batch blocks >> VMEM) a second grid axis
    # tiling the S dimension with an online-softmax accumulator would be needed.
    kernel = functools.partial(_tr_layer_kernel, tr_layer=tr_layer)
    return pl.pallas_call(
        kernel,
        out_shape=jax.ShapeDtypeStruct((b_sz, l_len, hsz), hidden.dtype),
        grid=(b_sz,),
        in_specs=[
            pl.BlockSpec((1, s_len, hsz), lambda i: (i, 0, 0)),     # hidden
            pl.BlockSpec((1, s_len, s_len), lambda i: (i, 0, 0)),   # adj_out
            pl.BlockSpec((1, s_len, s_len), lambda i: (i, 0, 0)),   # adj_out^T
            pl.BlockSpec((1, l_len, 1), lambda i: (i, 0, 0)),       # alias indices
            pl.BlockSpec((1, hsz), lambda i: (0, 0)),               # w1
            pl.BlockSpec((1, hsz), lambda i: (0, 0)),               # w2
            pl.BlockSpec(memory_space=pltpu.MemorySpace.SMEM),      # bias (1,1)
        ],
        out_specs=pl.BlockSpec((1, l_len, hsz), lambda i: (i, 0, 0)),
        compiler_params=pltpu.CompilerParams(
            dimension_semantics=("parallel",)),
    )(hidden, adj_out, adjT, alias3, w1, w2, bias2)


# ---------------------------------------------------------------------------
# Pure-JAX reference mirroring the PyTorch module exactly.
# ---------------------------------------------------------------------------
def _ref_forward(hidden, adj_out, alias_inputs, weight, bias, tr_layer):
    h = hidden.astype(jnp.float32)
    adj_out = adj_out.astype(jnp.float32)
    hsz = h.shape[-1]
    w = jnp.asarray(weight, jnp.float32).reshape(2 * hsz)
    w1, w2 = w[:hsz], w[hsz:]
    b = jnp.asarray(bias, jnp.float32).reshape(())
    for _ in range(tr_layer):
        a1 = h @ w1                                         # (B, S)
        a2 = h @ w2
        att = a1[:, :, None] + a2[:, None, :] + b
        att_out = jnp.tanh(att)
        alpha_out = jnp.where(adj_out == 1.0, att_out, 0.0)
        alpha_in = jnp.swapaxes(alpha_out, -1, -2)
        alpha = (alpha_out + alpha_in) / 2.0
        adj_sym = adj_out + jnp.swapaxes(adj_out, -1, -2)
        alpha = jnp.where(adj_sym == 0.0, -9.0e15, alpha)
        alpha = jax.nn.softmax(alpha, axis=-1)
        h = alpha @ h
    idx = alias_inputs.astype(jnp.int32)[..., None]         # (B, L, 1)
    return jnp.take_along_axis(h, idx, axis=1)              # (B, L, H)


# ---------------------------------------------------------------------------
if __name__ == "__main__":
    key = jax.random.PRNGKey(0)
    k1, k2, k3, k4, k5 = jax.random.split(key, 5)

    B, S, H, L = 2, 8, 32, 8
    TR_LAYER = 2

    hidden = jax.random.normal(k1, (B, S, H), dtype=jnp.float32)
    adj_out = jax.random.bernoulli(k2, 0.4, (B, S, S)).astype(jnp.float32)
    alias_inputs = jax.random.randint(k3, (B, L), 0, S, dtype=jnp.int32)
    weight = 0.1 * jax.random.normal(k4, (1, 2 * H), dtype=jnp.float32)
    bias = 0.1 * jax.random.normal(k5, (1,), dtype=jnp.float32)

    out = tr_layer_forward(hidden, adj_out, alias_inputs, weight, bias[0],
                           tr_layer=TR_LAYER)
    out = jax.block_until_ready(out)

    ref = _ref_forward(hidden, adj_out, alias_inputs, weight, bias[0], TR_LAYER)
    assert out.shape == (B, L, H), out.shape
    assert jnp.allclose(out, ref, atol=2e-4, rtol=2e-4), (
        float(jnp.max(jnp.abs(out - ref))))

    print("KERNEL_OK")
</pallas_src>

<mosaic_0001>
module attributes {stable_mosaic.version = 11 : i64} {
  func.func @_tr_layer_kernel(%arg0: i32, %arg1: memref<1x8x32xf32, #tpu.memory_space<vmem>>, %arg2: memref<1x8x8xf32, #tpu.memory_space<vmem>>, %arg3: memref<1x8x8xf32, #tpu.memory_space<vmem>>, %arg4: memref<1x8x1xi32, #tpu.memory_space<vmem>>, %arg5: memref<1x32xf32, #tpu.memory_space<vmem>>, %arg6: memref<1x32xf32, #tpu.memory_space<vmem>>, %arg7: memref<1x1xf32, #tpu.memory_space<smem>>, %arg8: memref<1x8x32xf32, #tpu.memory_space<vmem>>) attributes {dimension_semantics = [#tpu.dimension_semantics<parallel>], iteration_bounds = array<i64: 2>, scalar_prefetch = 0 : i64, scratch_operands = 0 : i64, tpu.core_type = #tpu.core_type<tc>, window_params = [{transform_indices = @transform_0, window_bounds = array<i64: 1, 8, 32>}, {transform_indices = @transform_1, window_bounds = array<i64: 1, 8, 8>}, {transform_indices = @transform_2, window_bounds = array<i64: 1, 8, 8>}, {transform_indices = @transform_3, window_bounds = array<i64: 1, 8, 1>}, {pipeline_mode = #tpu.pipeline_mode<synchronous>, transform_indices = @transform_4, window_bounds = array<i64: 1, 32>}, {pipeline_mode = #tpu.pipeline_mode<synchronous>, transform_indices = @transform_5, window_bounds = array<i64: 1, 32>}, {transform_indices = @transform_6, window_bounds = array<i64: 1, 1>}, {transform_indices = @transform_7, window_bounds = array<i64: 1, 8, 32>}]} {
    %c0 = arith.constant 0 : index
    %c0_0 = arith.constant 0 : index
    %c0_1 = arith.constant 0 : index
    %0 = vector.load %arg1[%c0, %c0_0, %c0_1] : memref<1x8x32xf32, #tpu.memory_space<vmem>>, vector<1x8x32xf32>
    %1 = vector.shape_cast %0 : vector<1x8x32xf32> to vector<8x32xf32>
    %c0_2 = arith.constant 0 : index
    %c0_3 = arith.constant 0 : index
    %c0_4 = arith.constant 0 : index
    %2 = vector.load %arg2[%c0_2, %c0_3, %c0_4] : memref<1x8x8xf32, #tpu.memory_space<vmem>>, vector<1x8x8xf32>
    %3 = vector.shape_cast %2 : vector<1x8x8xf32> to vector<8x8xf32>
    %c0_5 = arith.constant 0 : index
    %c0_6 = arith.constant 0 : index
    %c0_7 = arith.constant 0 : index
    %4 = vector.load %arg3[%c0_5, %c0_6, %c0_7] : memref<1x8x8xf32, #tpu.memory_space<vmem>>, vector<1x8x8xf32>
    %5 = vector.shape_cast %4 : vector<1x8x8xf32> to vector<8x8xf32>
    %c0_8 = arith.constant 0 : index
    %c0_9 = arith.constant 0 : index
    %6 = vector.load %arg5[%c0_8, %c0_9] : memref<1x32xf32, #tpu.memory_space<vmem>>, vector<1x32xf32>
    %c0_10 = arith.constant 0 : index
    %c0_11 = arith.constant 0 : index
    %7 = vector.load %arg6[%c0_10, %c0_11] : memref<1x32xf32, #tpu.memory_space<vmem>>, vector<1x32xf32>
    %c0_12 = arith.constant 0 : index
    %c0_13 = arith.constant 0 : index
    %8 = memref.load %arg7[%c0_12, %c0_13] : memref<1x1xf32, #tpu.memory_space<smem>>
    %cst = arith.constant 1.000000e+00 : f32
    %9 = vector.broadcast %cst : f32 to vector<8x8xf32>
    %10 = arith.cmpf oeq, %3, %9 : vector<8x8xf32>
    %cst_14 = arith.constant 1.000000e+00 : f32
    %11 = vector.broadcast %cst_14 : f32 to vector<8x8xf32>
    %12 = arith.cmpf oeq, %5, %11 : vector<8x8xf32>
    %13 = arith.addf %3, %5 : vector<8x8xf32>
    %cst_15 = arith.constant 0.000000e+00 : f32
    %14 = vector.broadcast %cst_15 : f32 to vector<8x8xf32>
    %15 = arith.cmpf oeq, %13, %14 : vector<8x8xf32>
    %16 = vector.broadcast %6 : vector<1x32xf32> to vector<8x32xf32>
    %17 = arith.mulf %1, %16 : vector<8x32xf32>
    %cst_16 = arith.constant dense<0.000000e+00> : vector<8xf32>
    %18 = vector.multi_reduction <add>, %17, %cst_16 [1] : vector<8x32xf32> to vector<8xf32>
    %19 = vector.shape_cast %18 : vector<8xf32> to vector<8x1xf32>
    %20 = vector.broadcast %7 : vector<1x32xf32> to vector<8x32xf32>
    %21 = arith.mulf %1, %20 : vector<8x32xf32>
    %cst_17 = arith.constant dense<0.000000e+00> : vector<8xf32>
    %22 = vector.multi_reduction <add>, %21, %cst_17 [1] : vector<8x32xf32> to vector<8xf32>
    %23 = vector.shape_cast %22 : vector<8xf32> to vector<8x1xf32>
    %24 = tpu.iota {dimensions = array<i32: 0>} : vector<8x8xi32>
    %25 = tpu.iota {dimensions = array<i32: 1>} : vector<8x8xi32>
    %26 = arith.cmpi eq, %24, %25 : vector<8x8xi32>
    %27 = vector.shape_cast %19 : vector<8x1xf32> to vector<8x1xf32>
    %28 = vector.broadcast %27 : vector<8x1xf32> to vector<8x8xf32>
    %cst_18 = arith.constant 0.000000e+00 : f32
    %29 = vector.broadcast %cst_18 : f32 to vector<8x8xf32>
    %30 = arith.select %26, %28, %29 : vector<8x8xi1>, vector<8x8xf32>
    %cst_19 = arith.constant dense<0.000000e+00> : vector<8xf32>
    %31 = vector.multi_reduction <add>, %30, %cst_19 [0] : vector<8x8xf32> to vector<8xf32>
    %32 = vector.shape_cast %31 : vector<8xf32> to vector<1x8xf32>
    %33 = tpu.iota {dimensions = array<i32: 0>} : vector<8x8xi32>
    %34 = tpu.iota {dimensions = array<i32: 1>} : vector<8x8xi32>
    %35 = arith.cmpi eq, %33, %34 : vector<8x8xi32>
    %36 = vector.shape_cast %23 : vector<8x1xf32> to vector<8x1xf32>
    %37 = vector.broadcast %36 : vector<8x1xf32> to vector<8x8xf32>
    %cst_20 = arith.constant 0.000000e+00 : f32
    %38 = vector.broadcast %cst_20 : f32 to vector<8x8xf32>
    %39 = arith.select %35, %37, %38 : vector<8x8xi1>, vector<8x8xf32>
    %cst_21 = arith.constant dense<0.000000e+00> : vector<8xf32>
    %40 = vector.multi_reduction <add>, %39, %cst_21 [0] : vector<8x8xf32> to vector<8xf32>
    %41 = vector.shape_cast %40 : vector<8xf32> to vector<1x8xf32>
    %42 = vector.broadcast %19 : vector<8x1xf32> to vector<8x8xf32>
    %43 = vector.broadcast %41 : vector<1x8xf32> to vector<8x8xf32>
    %44 = arith.addf %42, %43 : vector<8x8xf32>
    %45 = vector.broadcast %8 : f32 to vector<8x8xf32>
    %46 = arith.addf %44, %45 : vector<8x8xf32>
    %47 = math.tanh %46 : vector<8x8xf32>
    %48 = vector.broadcast %23 : vector<8x1xf32> to vector<8x8xf32>
    %49 = vector.broadcast %32 : vector<1x8xf32> to vector<8x8xf32>
    %50 = arith.addf %48, %49 : vector<8x8xf32>
    %51 = vector.broadcast %8 : f32 to vector<8x8xf32>
    %52 = arith.addf %50, %51 : vector<8x8xf32>
    %53 = math.tanh %52 : vector<8x8xf32>
    %cst_22 = arith.constant 0.000000e+00 : f32
    %54 = vector.broadcast %cst_22 : f32 to vector<8x8xf32>
    %55 = arith.select %10, %47, %54 : vector<8x8xi1>, vector<8x8xf32>
    %cst_23 = arith.constant 0.000000e+00 : f32
    %56 = vector.broadcast %cst_23 : f32 to vector<8x8xf32>
    %57 = arith.select %12, %53, %56 : vector<8x8xi1>, vector<8x8xf32>
    %58 = arith.addf %55, %57 : vector<8x8xf32>
    %cst_24 = arith.constant 5.000000e-01 : f32
    %59 = vector.broadcast %cst_24 : f32 to vector<8x8xf32>
    %60 = arith.mulf %59, %58 : vector<8x8xf32>
    %cst_25 = arith.constant -9.000000e+15 : f32
    %61 = vector.broadcast %cst_25 : f32 to vector<8x8xf32>
    %62 = arith.select %15, %61, %60 : vector<8x8xi1>, vector<8x8xf32>
    %cst_26 = arith.constant dense<0xFF800000> : vector<8xf32>
    %63 = vector.multi_reduction <maximumf>, %62, %cst_26 [1] : vector<8x8xf32> to vector<8xf32>
    %64 = vector.shape_cast %63 : vector<8xf32> to vector<8x1xf32>
    %65 = vector.broadcast %64 : vector<8x1xf32> to vector<8x8xf32>
    %66 = arith.subf %62, %65 : vector<8x8xf32>
    %67 = math.exp %66 : vector<8x8xf32>
    %cst_27 = arith.constant dense<0.000000e+00> : vector<8xf32>
    %68 = vector.multi_reduction <add>, %67, %cst_27 [1] : vector<8x8xf32> to vector<8xf32>
    %69 = vector.shape_cast %68 : vector<8xf32> to vector<8x1xf32>
    %70 = vector.broadcast %69 : vector<8x1xf32> to vector<8x8xf32>
    %71 = arith.divf %67, %70 : vector<8x8xf32>
    %cst_28 = arith.constant dense<0.000000e+00> : vector<8x32xf32>
    %72 = tpu.matmul %71, %1, %cst_28 {dimension_numbers = #tpu.dot_dimension_numbers<[1], [0], [0], [1], [0, 0, 1, 1], [], []>} : vector<8x8xf32>, vector<8x32xf32>, vector<8x32xf32> -> vector<8x32xf32>
    %73 = vector.broadcast %6 : vector<1x32xf32> to vector<8x32xf32>
    %74 = arith.mulf %72, %73 : vector<8x32xf32>
    %cst_29 = arith.constant dense<0.000000e+00> : vector<8xf32>
    %75 = vector.multi_reduction <add>, %74, %cst_29 [1] : vector<8x32xf32> to vector<8xf32>
    %76 = vector.shape_cast %75 : vector<8xf32> to vector<8x1xf32>
    %77 = vector.broadcast %7 : vector<1x32xf32> to vector<8x32xf32>
    %78 = arith.mulf %72, %77 : vector<8x32xf32>
    %cst_30 = arith.constant dense<0.000000e+00> : vector<8xf32>
    %79 = vector.multi_reduction <add>, %78, %cst_30 [1] : vector<8x32xf32> to vector<8xf32>
    %80 = vector.shape_cast %79 : vector<8xf32> to vector<8x1xf32>
    %81 = tpu.iota {dimensions = array<i32: 0>} : vector<8x8xi32>
    %82 = tpu.iota {dimensions = array<i32: 1>} : vector<8x8xi32>
    %83 = arith.cmpi eq, %81, %82 : vector<8x8xi32>
    %84 = vector.shape_cast %76 : vector<8x1xf32> to vector<8x1xf32>
    %85 = vector.broadcast %84 : vector<8x1xf32> to vector<8x8xf32>
    %cst_31 = arith.constant 0.000000e+00 : f32
    %86 = vector.broadcast %cst_31 : f32 to vector<8x8xf32>
    %87 = arith.select %83, %85, %86 : vector<8x8xi1>, vector<8x8xf32>
    %cst_32 = arith.constant dense<0.000000e+00> : vector<8xf32>
    %88 = vector.multi_reduction <add>, %87, %cst_32 [0] : vector<8x8xf32> to vector<8xf32>
    %89 = vector.shape_cast %88 : vector<8xf32> to vector<1x8xf32>
    %90 = tpu.iota {dimensions = array<i32: 0>} : vector<8x8xi32>
    %91 = tpu.iota {dimensions = array<i32: 1>} : vector<8x8xi32>
    %92 = arith.cmpi eq, %90, %91 : vector<8x8xi32>
    %93 = vector.shape_cast %80 : vector<8x1xf32> to vector<8x1xf32>
    %94 = vector.broadcast %93 : vector<8x1xf32> to vector<8x8xf32>
    %cst_33 = arith.constant 0.000000e+00 : f32
    %95 = vector.broadcast %cst_33 : f32 to vector<8x8xf32>
    %96 = arith.select %92, %94, %95 : vector<8x8xi1>, vector<8x8xf32>
    %cst_34 = arith.constant dense<0.000000e+00> : vector<8xf32>
    %97 = vector.multi_reduction <add>, %96, %cst_34 [0] : vector<8x8xf32> to vector<8xf32>
    %98 = vector.shape_cast %97 : vector<8xf32> to vector<1x8xf32>
    %99 = vector.broadcast %76 : vector<8x1xf32> to vector<8x8xf32>
    %100 = vector.broadcast %98 : vector<1x8xf32> to vector<8x8xf32>
    %101 = arith.addf %99, %100 : vector<8x8xf32>
    %102 = vector.broadcast %8 : f32 to vector<8x8xf32>
    %103 = arith.addf %101, %102 : vector<8x8xf32>
    %104 = math.tanh %103 : vector<8x8xf32>
    %105 = vector.broadcast %80 : vector<8x1xf32> to vector<8x8xf32>
    %106 = vector.broadcast %89 : vector<1x8xf32> to vector<8x8xf32>
    %107 = arith.addf %105, %106 : vector<8x8xf32>
    %108 = vector.broadcast %8 : f32 to vector<8x8xf32>
    %109 = arith.addf %107, %108 : vector<8x8xf32>
    %110 = math.tanh %109 : vector<8x8xf32>
    %cst_35 = arith.constant 0.000000e+00 : f32
    %111 = vector.broadcast %cst_35 : f32 to vector<8x8xf32>
    %112 = arith.select %10, %104, %111 : vector<8x8xi1>, vector<8x8xf32>
    %cst_36 = arith.constant 0.000000e+00 : f32
    %113 = vector.broadcast %cst_36 : f32 to vector<8x8xf32>
    %114 = arith.select %12, %110, %113 : vector<8x8xi1>, vector<8x8xf32>
    %115 = arith.addf %112, %114 : vector<8x8xf32>
    %cst_37 = arith.constant 5.000000e-01 : f32
    %116 = vector.broadcast %cst_37 : f32 to vector<8x8xf32>
    %117 = arith.mulf %116, %115 : vector<8x8xf32>
    %cst_38 = arith.constant -9.000000e+15 : f32
    %118 = vector.broadcast %cst_38 : f32 to vector<8x8xf32>
    %119 = arith.select %15, %118, %117 : vector<8x8xi1>, vector<8x8xf32>
    %cst_39 = arith.constant dense<0xFF800000> : vector<8xf32>
    %120 = vector.multi_reduction <maximumf>, %119, %cst_39 [1] : vector<8x8xf32> to vector<8xf32>
    %121 = vector.shape_cast %120 : vector<8xf32> to vector<8x1xf32>
    %122 = vector.broadcast %121 : vector<8x1xf32> to vector<8x8xf32>
    %123 = arith.subf %119, %122 : vector<8x8xf32>
    %124 = math.exp %123 : vector<8x8xf32>
    %cst_40 = arith.constant dense<0.000000e+00> : vector<8xf32>
    %125 = vector.multi_reduction <add>, %124, %cst_40 [1] : vector<8x8xf32> to vector<8xf32>
    %126 = vector.shape_cast %125 : vector<8xf32> to vector<8x1xf32>
    %127 = vector.broadcast %126 : vector<8x1xf32> to vector<8x8xf32>
    %128 = arith.divf %124, %127 : vector<8x8xf32>
    %cst_41 = arith.constant dense<0.000000e+00> : vector<8x32xf32>
    %129 = tpu.matmul %128, %72, %cst_41 {dimension_numbers = #tpu.dot_dimension_numbers<[1], [0], [0], [1], [0, 0, 1, 1], [], []>} : vector<8x8xf32>, vector<8x32xf32>, vector<8x32xf32> -> vector<8x32xf32>
    %c0_42 = arith.constant 0 : index
    %c0_43 = arith.constant 0 : index
    %c0_44 = arith.constant 0 : index
    %130 = vector.load %arg4[%c0_42, %c0_43, %c0_44] : memref<1x8x1xi32, #tpu.memory_space<vmem>>, vector<1x8x1xi32>
    %131 = vector.shape_cast %130 : vector<1x8x1xi32> to vector<8x1xi32>
    %132 = tpu.iota {dimensions = array<i32: 1>} : vector<8x8xi32>
    %133 = vector.broadcast %131 : vector<8x1xi32> to vector<8x8xi32>
    %134 = arith.cmpi eq, %132, %133 : vector<8x8xi32>
    %135 = arith.extui %134 : vector<8x8xi1> to vector<8x8xi32>
    %136 = arith.sitofp %135 : vector<8x8xi32> to vector<8x8xf32>
    %cst_45 = arith.constant dense<0.000000e+00> : vector<8x32xf32>
    %137 = tpu.matmul %136, %129, %cst_45 {dimension_numbers = #tpu.dot_dimension_numbers<[1], [0], [0], [1], [0, 0, 1, 1], [], []>} : vector<8x8xf32>, vector<8x32xf32>, vector<8x32xf32> -> vector<8x32xf32>
    %c0_46 = arith.constant 0 : index
    %c0_47 = arith.constant 0 : index
    %c0_48 = arith.constant 0 : index
    %138 = vector.load %arg8[%c0_46, %c0_47, %c0_48] : memref<1x8x32xf32, #tpu.memory_space<vmem>>, vector<1x8x32xf32>
    %139 = vector.shape_cast %138 : vector<1x8x32xf32> to vector<8x32xf32>
    %140 = vector.shape_cast %137 : vector<8x32xf32> to vector<1x8x32xf32>
    tpu.vector_store %arg8[%c0_46, %c0_47, %c0_48], %140 {strides = array<i32>} : memref<1x8x32xf32, #tpu.memory_space<vmem>>, vector<1x8x32xf32>,
    return
  }
  func.func @transform_0(%arg0: i32) -> (i32, i32, i32) {
    %c0_i32 = arith.constant 0 : i32
    %c0_i32_0 = arith.constant 0 : i32
    %c0_i32_1 = arith.constant 0 : i32
    return %arg0, %c0_i32, %c0_i32_0 : i32, i32, i32
  }
  func.func @transform_1(%arg0: i32) -> (i32, i32, i32) {
    %c0_i32 = arith.constant 0 : i32
    %c0_i32_0 = arith.constant 0 : i32
    %c0_i32_1 = arith.constant 0 : i32
    return %arg0, %c0_i32, %c0_i32_0 : i32, i32, i32
  }
  func.func @transform_2(%arg0: i32) -> (i32, i32, i32) {
    %c0_i32 = arith.constant 0 : i32
    %c0_i32_0 = arith.constant 0 : i32
    %c0_i32_1 = arith.constant 0 : i32
    return %arg0, %c0_i32, %c0_i32_0 : i32, i32, i32
  }
  func.func @transform_3(%arg0: i32) -> (i32, i32, i32) {
    %c0_i32 = arith.constant 0 : i32
    %c0_i32_0 = arith.constant 0 : i32
    %c0_i32_1 = arith.constant 0 : i32
    return %arg0, %c0_i32, %c0_i32_0 : i32, i32, i32
  }
  func.func @transform_4(%arg0: i32) -> (i32, i32) {
    %c0_i32 = arith.constant 0 : i32
    %c0_i32_0 = arith.constant 0 : i32
    %c0_i32_1 = arith.constant 0 : i32
    return %c0_i32, %c0_i32_0 : i32, i32
  }
  func.func @transform_5(%arg0: i32) -> (i32, i32) {
    %c0_i32 = arith.constant 0 : i32
    %c0_i32_0 = arith.constant 0 : i32
    %c0_i32_1 = arith.constant 0 : i32
    return %c0_i32, %c0_i32_0 : i32, i32
  }
  func.func @transform_6(%arg0: i32) -> (i32, i32) {
    %c0_i32 = arith.constant 0 : i32
    %c0_i32_0 = arith.constant 0 : i32
    %c0_i32_1 = arith.constant 0 : i32
    return %c0_i32, %c0_i32_0 : i32, i32
  }
  func.func @transform_7(%arg0: i32) -> (i32, i32, i32) {
    %c0_i32 = arith.constant 0 : i32
    %c0_i32_0 = arith.constant 0 : i32
    %c0_i32_1 = arith.constant 0 : i32
    return %arg0, %c0_i32, %c0_i32_0 : i32, i32, i32
  }
}

</mosaic_0001>

<bundles_post_ra>
// kernel: tpu_custom_call.1
= control target key start
LH: loop header
LB: loop body
LE: loop exit
PB: predicated region body
PF: predicated region fallthrough
CT: control target
= control target key end

     0   :  { %s1465_s0 = inlined_call_operand.vmem [shape: f32[2,8,32], index: 0, kind: input, shape index: {}]   ;;  %s1466_s1 = inlined_call_operand.hbm [shape: f32[2,8,8], index: 1, kind: input, shape index: {}]   ;;  %s1467_s2 = inlined_call_operand.hbm [shape: f32[2,8,8], index: 2, kind: input, shape index: {}]   ;;  %s1468_s3 = inlined_call_operand.vmem [shape: s32[2,8,1], index: 3, kind: input, shape index: {}]   ;;  %s1469_s4 = inlined_call_operand.vmem [shape: f32[1,32], index: 4, kind: input, shape index: {}]   ;;  %s1470_s5 = inlined_call_operand.vmem [shape: f32[1,32], index: 5, kind: input, shape index: {}]   ;;  %s1471_s6 = inlined_call_operand.<no memory space> [shape: f32[1,1], index: 6, kind: input, shape index: {}]   ;;  %s1472_s7 = inlined_call_operand.hbm [shape: f32[2,8,32], index: 7, kind: output, shape index: {}]  }
   0x1   :  { %12 = sst [smem:[#allocation2]] %s1471_s6 }
   0x2   :  { %13 = vsyncpa [#allocation4], 0 }
   0x3   :  { %15 = vsyncpa [#allocation4 + $0x1], 0 }
   0x4   :  { %16 = vsyncpa [#allocation7], 0 }
   0x5   :  { %18 = vsyncpa [#allocation7 + $0x1], 0 }
   0x6   :  { %19 = vsyncpa [#allocation5], 0 }
   0x7   :  { %21 = vsyncpa [#allocation5 + $0x1], 0  ;;  %s1142_s26 = smov 0   ;;  %s1144_s27 = smov 0  }
   0x8   :  { %s1146_s28 = smov 0   ;;  %s1148_s29 = smov 0  }
   0x9 LB: > { %s1163_s6 = sadd.s32 4294967295, %s1091_s29   ;;  %s846_s30 = sadd.s32 4294967294, %s1091_s29   ;;  %s1091_s29 = sphi %s1148_s29, %s1491_s29   ;;  %s1087_s28 = sphi %s1146_s28, %s1490_s28   ;;  %s1083_s27 = sphi %s1144_s27, %s1489_s27   ;;  %s1079_s26 = sphi %s1142_s26, %s1488_s26  }
   0xa   : > { %s1167_s8 = sadd.s32 1, %s1091_s29   ;;  %s60_s9 = sadd.s32 1, %s1087_s28 }
   0xb   : > { %s57_s10 = ssub.s32 %s1091_s29, %s1167_s8  ;;  %p67_p0 = scmp.ne.s32.totalorder %s1087_s28, %s1083_s27 }
   0xc   : > { %p58_p1 = scmp.eq.s32.totalorder %s57_s10, 0  ;;  %p68_p2 = scmp.eq.s32.totalorder %s1091_s29, 0 }
   0xd   : > { %p73_p3 = scmp.ne.s32.totalorder %s1083_s27, %s1079_s26  ;;  %p74_p4 = scmp.eq.s32.totalorder %s1163_s6, 0 }
   0xe   : > { %s1179_s11 = scalar_select %p58_p1, %s1087_s28, %s60_s9  }
   0xf   : > { %p1181_p5 = por %p68_p2, %p67_p0  ;;  %p1185_p6 = por %p74_p4, %p73_p3 }
  0x10   : > { %p212_p7 = scmp.eq.s32.totalorder %s1163_s6, 1  ;;  %p218_p8 = scmp.eq.s32.totalorder %s846_s30, 1 }
  0x11   : > { %s1476_s13 = scalar_select %p1185_p6, 1, 0 }
  0x12   : > { %p907_p10 = scmp.lt.s32.totalorder %s1091_s29, 2  ;;  %p1192_p11 = por %p212_p7, %p67_p0 }
  0x13   : > { %p1196_p12 = por %p218_p8, %p73_p3  ;;  %s1201_s16 = sand.u32 1, %s1087_s28  }
  0x14   : > { %s1477_s14 = scalar_select %p1192_p11, 1, 0 }
  0x15   : > { %s1478_s15 = scalar_select %p1196_p12, 1, 0 }
  0x16   : > { %s850_s17 = sshll.u32 %s1091_s29, 7  ;;  %s849_s18 = sshll.u32 %s1201_s16, 3 }
  0x17   : > { %s1210_s21 = scalar_lea.hbm %s1466_s1, %s850_s17  ;;  %s258_s22 = scalar_lea.vmem [#allocation3], %s849_s18 }
  0x18   : > { %s265_s23 = sshll.u32 %s258_s22, 4  ;;  %p1216_p13 = pnand %p907_p10, %p1181_p5  ;;  %s1220_s23 = int_to_ptr.vmem [resolvable:$true] %s265_s23 }
  0x19   : > { %s255_s25 = scalar_lea.sflag [#allocation4], %s1201_s16  ;;  %s961_s30 = scalar_lea.hbm %s1210_s21, 128 }
  0x1a   : > { %p962_p2 = scmp.ne.s32.totalorder %s1210_s21, %s961_s30  ;;  %p963_p3 = pneg %p1216_p13 }
  0x1b   : > { %s966_s12 = scalar_lea.hbm %s1466_s1, 256  ;;  %p967_p5 = scmp.lt.u32.totalorder %s1210_s21, %s1466_s1 }
  0x1c   : > { %p964_p4 = pnand %p963_p3, %p962_p2  ;;  %p968_p8 = scmp.lt.u32.totalorder %s966_s12, %s961_s30 }
  0x1d   : > { %p970_p9 = scmp.lt.u32.totalorder %s961_s30, %s1210_s21 }
  0x1e   : > { %p965_p7 = pneg %p964_p4  ;;  %p969_p10 = por %p968_p8, %p967_p5 }
  0x20   : > { %p971_p0 = por %p970_p9, %p969_p10 }
  0x22   : > { %p972_p1 = pnand %p971_p0, %p965_p7 }
  0x24   : > { %975 = shalt.err (!%p972_p1)
}
  0x25   : > { %s976_s22 = scalar_lea.vmem %s1220_s23, 128  ;;  %s1093_s9 = smov [#allocation3]  }
  0x26   : > { %p977_p2 = scmp.ne.s32.totalorder %s1220_s23, %s976_s22  ;;  %s981_s10 = sshll.u32 %s1093_s9, 4  ;;  %s982_s10 = int_to_ptr.vmem [resolvable:$false] %s981_s10 }
  0x27   : > { %s983_s19 = scalar_lea.vmem %s982_s10, 256  ;;  %p984_p11 = scmp.lt.s32.totalorder %s1220_s23, %s982_s10 }
  0x28   : > { %p979_p4 = pnand %p977_p2, %p963_p3  ;;  %p985_p5 = scmp.lt.s32.totalorder %s983_s19, %s976_s22 }
  0x2a   : > { %p980_p12 = pneg %p979_p4  ;;  %p986_p8 = por %p985_p5, %p984_p11 }
  0x2c   : > { %p987_p9 = pnand %p986_p8, %p980_p12 }
  0x2e   : > { %990 = shalt.err (!%p987_p9)
}
  0x2f   : > { %899 = dma.hbm_to_vmem [thread:$0]  (!%p1216_p13), %s1210_s21, 128, %s1220_s23, %s255_s25  }
  0x30   : > { %p1480_p0 = scmp.lt.s32.totalorder %s1091_s29, 3  ;;  %p1481_p1 = scmp.ge.s32.totalorder %s1091_s29, 1 }
  0x31   : > { %s1263_s22 = scalar_lea.hbm %s1467_s2, %s850_s17  ;;  %s276_s9 = scalar_lea.vmem [#allocation6], %s849_s18 }
  0x32   : > { %p1254_p7 = pnand %p1481_p1, %p1480_p0  ;;  %s283_s10 = sshll.u32 %s276_s9, 4  ;;  %s284_s10 = int_to_ptr.vmem [resolvable:$true] %s283_s10 }
  0x33   : > { %s273_s21 = scalar_lea.sflag [#allocation7], %s1201_s16  ;;  %s991_s23 = scalar_lea.hbm %s1263_s22, 128 }
  0x34   : > { %s1482_s30 = scalar_select %p1254_p7, 1, 0 }
  0x35   : > { %p992_p11 = scmp.ne.s32.totalorder %s1263_s22, %s991_s23  ;;  %s996_s17 = scalar_lea.hbm %s1467_s2, 256 }
  0x36   : > { %p997_p2 = scmp.lt.u32.totalorder %s1263_s22, %s1467_s2  ;;  %p998_p4 = scmp.lt.u32.totalorder %s996_s17, %s991_s23 }
  0x37   : > { %p994_p12 = pnand %p992_p11, %p963_p3  ;;  %p1000_p8 = scmp.lt.u32.totalorder %s991_s23, %s1263_s22 }
  0x38   : > { %p999_p5 = por %p998_p4, %p997_p2 }
  0x39   : > { %p995_p10 = pneg %p994_p12 }
  0x3a   : > { %p1001_p9 = por %p1000_p8, %p999_p5 }
  0x3c   : > { %p1002_p0 = pnand %p1001_p9, %p995_p10 }
  0x3e   : > { %1005 = shalt.err (!%p1002_p0)
}
  0x3f   : > { %s1006_s16 = scalar_lea.vmem %s284_s10, 128  ;;  %s1094_s18 = smov [#allocation6]  }
  0x40   : > { %p1007_p1 = scmp.ne.s32.totalorder %s284_s10, %s1006_s16  ;;  %s1011_s9 = sshll.u32 %s1094_s18, 4  ;;  %s1012_s9 = int_to_ptr.vmem [resolvable:$false] %s1011_s9 }
  0x41   : > { %s1013_s25 = scalar_lea.vmem %s1012_s9, 256  ;;  %p1014_p6 = scmp.lt.s32.totalorder %s284_s10, %s1012_s9 }
  0x42   : > { %p1009_p11 = pnand %p1007_p1, %p963_p3  ;;  %p1015_p7 = scmp.lt.s32.totalorder %s1013_s25, %s1006_s16 }
  0x44   : > { %p1010_p12 = pneg %p1009_p11  ;;  %p1016_p2 = por %p1015_p7, %p1014_p6 }
  0x46   : > { %p1017_p4 = pnand %p1016_p2, %p1010_p12 }
  0x48   : > { %1020 = shalt.err (!%p1017_p4)
}
  0x49   : > { %902 = dma.hbm_to_vmem [thread:$0]  (!%p1216_p13), %s1263_s22, 128, %s284_s10, %s273_s21  }
  0x4a   : > { %p1483_p10 = scmp.ne.s32.totalorder %s1482_s30, 0 }
  0x4b   : > { %s1290_s23 = sand.u32 (!%p1483_p10), 1, %s1083_s27   ;;  %p1484_p6 = scmp.ne.s32.totalorder (!%p1483_p10), %s1476_s13, 0 }
  0x4c   : > { %299 = sbr.rel (%p1483_p10) target bundleno = 1737 (0x6c9), region = 48  ;;  %s1293_s19 = sshll.u32 (!%p1483_p10), %s1290_s23, 3 }
  0x4d   : > { %s302_s17 = scalar_lea.sflag (!%p1483_p10), [#allocation4], %s1290_s23  ;;  %s305_s12 = scalar_lea.vmem (!%p1483_p10), [#allocation3], %s1293_s19 }
  0x53   : > { %1066 = dma.done.wait (%p1484_p6), %s302_s17, 128  }
  0x54   : > { %1068 = vsyncadd (%p1484_p6), %s302_s17, 4294967168  ;;  %s311_s24 = scalar_lea.sflag [#allocation7], %s1290_s23  ;;  %s314_s30 = scalar_lea.vmem [#allocation6], %s1293_s19 }
  0x55   : > { %1070 = dma.done.wait (%p1484_p6), %s311_s24, 128  }
  0x56   : > { %1072 = vsyncadd (%p1484_p6), %s311_s24, 4294967168  ;;  %p358_p13 = scmp.lt.s32.totalorder %s1163_s6, 1  ;;  %v1322_v1 = vld [vmem:[%s1469_s4] ss:$0 sm:$0xff]  ;;  %vm383_vm0 = vcmask 261120   ;;  %v397_v7 = vlaneseq  ;;  %vm403_vm2 = vcmask 64512  }
  0x57   : > { %v1327_v2 = vld [vmem:[%s1470_s5] ss:$0 sm:$0xff]  ;;  %s371_s17 = sld [smem:[#allocation2]]  ;;  %v1359_v34 = vld [vmem:[%s314_s30] sm:$0xff]  ;;  %v1095_v49 = vmov 0.0   ;;  %vm1096_vm6 = vmmov 0  }
  0x58   : > { %s1309_s22 = scalar_select %p358_p13, %s1163_s6, 1  ;;  %v1335_v8 = vshrl.u32 %v397_v7, 7  ;;  %v1337_v9 = vand.u32 127, %v397_v7  ;;  %v1355_v33 = vld [vmem:[%s305_s12] sm:$0xff]  ;;  %vm373_vm4 = vcmp.eq.f32.partialorder %v1359_v34, 1.0  ;;  %875 = vmatprep.subr.mxu0 %v1095_v49  ;;  %877 = vmatprep.mubr.msk.f32.mxu0 %vm1096_vm6, %v1095_v49 }
  0x59   : > { %vm372_vm3 = vcmp.eq.f32.partialorder %v1355_v33, 1.0  ;;  %v1365_v36 = vadd.f32 %v1359_v34, %v1355_v33  ;;  %880 = vmatprep.subr.mxu1 %v1095_v49  ;;  %882 = vmatprep.mubr.msk.f32.mxu1 %vm1096_vm6, %v1095_v49  ;;  %s716_s9 = scalar_lea.sflag [#allocation5], %s1290_s23  ;;  %p1485_p7 = scmp.ne.s32.totalorder %s1477_s14, 0 }
  0x5a   : > { %s857_s10 = sshll.u32 %s1309_s22, 3  ;;  %vm401_vm1 = vcmp.eq.s32.totalorder %v1335_v8, %v1337_v9  ;;  %s866_s22 = sshll.u32 %s1163_s6, 7 }
  0x5b   : > { %s361_s16 = scalar_lea.vmem %s1465_s0, %s857_s10  ;;  %vm375_vm5 = vcmp.eq.f32.partialorder %v1365_v36, 0.0  ;;  %s365_s30 = scalar_lea.vmem %s1468_s3, %s857_s10 }
  0x5c   : > { %v1317_v0 = vld [vmem:[%s361_s16] sm:$0xff]  ;;  %s357_s10 = scalar_lea.vmem [#allocation8], %s1293_s19  ;;  %s1420_s18 = scalar_lea.hbm %s1472_s7, %s866_s22 }
  0x5d   : > { %v382_v3 = vmul.f32 %v1322_v1, %v1317_v0  ;;  %v393_v4 = vmul.f32 %v1327_v2, %v1317_v0  ;;  %v1349_v26 = vstv %s371_s17  ;;  %876 = vmatpush3.msra.mxu0 %v1317_v0  ;;  %s729_s21 = sshll.u32 %s357_s10, 4  ;;  %s1098_s6 = smov [#allocation8]   ;;  %s1422_s21 = int_to_ptr.vmem [resolvable:$true] %s729_s21 }
  0x5e   : > { %885 = vmatprep.subr.mxu0 %v1095_v49  ;;  %s1021_s13 = scalar_lea.vmem %s1422_s21, 128  ;;  %s1025_s19 = sshll.u32 %s1098_s6, 4  ;;  %s1026_s19 = int_to_ptr.vmem [resolvable:$false] %s1025_s19 }
  0x5f   : > { %v384_v5 = vsel %vm383_vm0, %v382_v3, 0.0  ;;  %v394_v6 = vsel %vm383_vm0, %v393_v4, 0.0  ;;  %p1022_p3 = scmp.ne.s32.totalorder %s1422_s21, %s1021_s13  ;;  %s1027_s25 = scalar_lea.vmem %s1026_s19, 256 }
  0x60   : > { %385 = vadd.xlane.f32.xlu0 %v384_v5  ;;  %p1028_p9 = scmp.lt.s32.totalorder %s1422_s21, %s1026_s19  ;;  %p1029_p0 = scmp.lt.s32.totalorder %s1027_s25, %s1021_s13 }
  0x61   : > { %p1023_p5 = pnand %p1022_p3, %p1485_p7 }
  0x62   : > { %p1030_p1 = por %p1029_p0, %p1028_p9 }
  0x63   : > { %p1024_p8 = pneg %p1023_p5 }
  0x64   : > { %395 = vadd.xlane.f32.xlu0 %v394_v6 }
  0x65   : > { %p1031_p11 = pnand %p1030_p1, %p1024_p8 }
  0xed   : > { %v386_v10 = vpop.xlane.xlu0 %385 }
  0xee   : > { %v402_v11 = vsel %vm401_vm1, %v386_v10, 0.0 }
  0xef   : > { %v404_v12 = vsel %vm403_vm2, %v402_v11, 0.0 }
  0xf0   : > { %v405_v13 = vrot.slane %v404_v12, 4 }
  0xf1   : > { %v396_v14 = vpop.xlane.xlu0 %395 }
  0xf2   : > { %v406_v15 = vadd.f32 %v405_v13, %v404_v12  ;;  %v411_v16 = vsel %vm401_vm1, %v396_v14, 0.0 }
  0xf3   : > { %v412_v17 = vsel %vm403_vm2, %v411_v16, 0.0 }
  0xf4   : > { %v407_v18 = vrot.slane %v406_v15, 2  ;;  %v413_v19 = vrot.slane %v412_v17, 4 }
  0xf6   : > { %v408_v20 = vadd.f32 %v407_v18, %v406_v15  ;;  %v414_v21 = vadd.f32 %v413_v19, %v412_v17 }
  0xf8   : > { %v409_v22 = vrot.slane %v408_v20, 1  ;;  %v415_v23 = vrot.slane %v414_v21, 2 }
  0xfa   : > { %v410_v24 = vadd.f32 %v409_v22, %v408_v20  ;;  %v416_v25 = vadd.f32 %v415_v23, %v414_v21 }
  0xfc   : > { %v417_v27 = vrot.slane %v416_v25, 1  ;;  %v423_v28 = vadd.f32 %v410_v24, %v396_v14 }
  0xfe   : > { %v418_v29 = vadd.f32 %v417_v27, %v416_v25  ;;  %v424_v30 = vadd.f32 %v423_v28, %v1349_v26 }
 0x100   : > { %v419_v31 = vadd.f32 %v418_v29, %v386_v10  ;;  %945 = vtanh.f32 %v424_v30 }
 0x102   : > { %v421_v32 = vadd.f32 %v1349_v26, %v419_v31  ;;  %v1097_v31 = vmov 0  }
 0x103   : > { %944 = vset.pattern.permute.xlu0 %v1097_v31 }
 0x104   : > { %947 = vtanh.f32 %v421_v32  ;;  %v634_v32 = vld [vmem:[%s365_s30] sm:$0xff] }
 0x10a   : > { %v946_v35 = vpop.eup %945 }
 0x10b   : > { %v427_v39 = vsel %vm373_vm4, %v946_v35, 0.0 }
 0x10e   : > { %v948_v37 = vpop.eup %947 }
 0x10f   : > { %v426_v38 = vsel %vm372_vm3, %v948_v37, 0.0 }
 0x110   : > { %v428_v40 = vadd.f32 %v427_v39, %v426_v38 }
 0x112   : > { %v429_v41 = vmul.f32 0.5, %v428_v40 }
 0x114   : > { %v430_v42 = vsel %vm375_vm5, -9e+15, %v429_v41 }
 0x115   : > { %v431_v43 = vsel %vm403_vm2, %v430_v42, -inf }
 0x116   : > { %432 = vmax.xlane.f32.xlu1 %v431_v43 }
 0x1a3   : > { %v433_v44 = vpop.xlane.xlu1 %432 }
 0x1a4   : > { %v434_v45 = vsub.f32 %v430_v42, %v433_v44 }
 0x1a6   : > { %v435_v46 = vmul.f32 1.442695, %v434_v45 }
 0x1a8   : > { %949 = vpow2.f32 %v435_v46 }
 0x1b2   : > { %v950_v47 = vpop.eup %949 }
 0x1b3   : > { %v437_v48 = vsel %vm403_vm2, %v950_v47, 0.0 }
 0x1b4   : > { %438 = vadd.xlane.f32.xlu1 %v437_v48 }
 0x241   : > { %v439_v50 = vpop.xlane.xlu1 %438 }
 0x242   : > { %951 = vrcp.f32 %v439_v50 }
 0x24c   : > { %v952_v51 = vpop.eup %951 }
 0x24d   : > { %v441_v52 = vmul.f32 %v952_v51, %v950_v47 }
 0x24f   : > { %878 = vmatmul.mubr.msk.f32.vlgmr.msra.gmra.mrb[0].mxu0 %vm403_vm2, %v441_v52 }
 0x250   : > { %887 = vmatprep.mubr.msk.f32.mxu0 %vm1096_vm6, %v1095_v49 }
 0x322   : > { %v511_v53 = vpop.f32.mrb[0].mxu0 }
 0x323   : > { %v879_v54 = vpop.f32.mrb[1].mxu0  ;;  %881 = vmatpush3.msra.mxu1 %v511_v53  ;;  %v519_v55 = vmul.f32 %v1327_v2, %v511_v53  ;;  %v515_v56 = vmul.f32 %v1322_v1, %v511_v53 }
 0x325   : > { %v520_v57 = vsel %vm383_vm0, %v519_v55, 0.0  ;;  %v516_v58 = vsel %vm383_vm0, %v515_v56, 0.0 }
 0x326   : > { %521 = vadd.xlane.f32.xlu1 %v520_v57  ;;  %517 = vadd.xlane.f32.xlu0 %v516_v58 }
 0x3b3   : > { %v522_v59 = vpop.xlane.xlu1 %521  ;;  %v518_v60 = vpop.xlane.xlu0 %517 }
 0x3b4   : > { %v531_v61 = vsel %vm401_vm1, %v522_v59, 0.0  ;;  %v523_v62 = vsel %vm401_vm1, %v518_v60, 0.0 }
 0x3b5   : > { %v532_v63 = vsel %vm403_vm2, %v531_v61, 0.0  ;;  %v524_v0 = vsel %vm403_vm2, %v523_v62, 0.0 }
 0x3b6   : > { %v533_v1 = vrot.slane %v532_v63, 4  ;;  %v525_v2 = vrot.slane %v524_v0, 4 }
 0x3b8   : > { %v534_v3 = vadd.f32 %v533_v1, %v532_v63  ;;  %v526_v4 = vadd.f32 %v525_v2, %v524_v0 }
 0x3ba   : > { %v535_v5 = vrot.slane %v534_v3, 2  ;;  %v527_v6 = vrot.slane %v526_v4, 2 }
 0x3bc   : > { %v536_v7 = vadd.f32 %v535_v5, %v534_v3  ;;  %v528_v10 = vadd.f32 %v527_v6, %v526_v4 }
 0x3be   : > { %v537_v11 = vrot.slane %v536_v7, 1  ;;  %v529_v12 = vrot.slane %v528_v10, 1 }
 0x3c0   : > { %v538_v13 = vadd.f32 %v537_v11, %v536_v7  ;;  %v530_v14 = vadd.f32 %v529_v12, %v528_v10 }
 0x3c2   : > { %v539_v15 = vadd.f32 %v538_v13, %v518_v60  ;;  %v542_v16 = vadd.f32 %v530_v14, %v522_v59 }
 0x3c4   : > { %v540_v8 = vadd.f32 %v539_v15, %v1349_v26  ;;  %v543_v17 = vadd.f32 %v542_v16, %v1349_v26 }
 0x3c6   : > { %953 = vtanh.f32 %v540_v8 }
 0x3c7   : > { %955 = vtanh.f32 %v543_v17 }
 0x3d0   : > { %v954_v18 = vpop.eup %953 }
 0x3d1   : > { %v956_v19 = vpop.eup %955  ;;  %v545_v20 = vsel %vm372_vm3, %v954_v18, 0.0 }
 0x3d2   : > { %v546_v21 = vsel %vm373_vm4, %v956_v19, 0.0 }
 0x3d3   : > { %v547_v22 = vadd.f32 %v546_v21, %v545_v20 }
 0x3d5   : > { %v548_v23 = vmul.f32 0.5, %v547_v22 }
 0x3d7   : > { %v549_v24 = vsel %vm375_vm5, -9e+15, %v548_v23 }
 0x3d8   : > { %v550_v25 = vsel %vm403_vm2, %v549_v24, -inf }
 0x3d9   : > { %551 = vmax.xlane.f32.xlu0 %v550_v25 }
 0x3ef   : > { %636 = vperm.xlu0 %944, %v634_v32  }
 0x466   : > { %v552_v26 = vpop.xlane.xlu0 %551 }
 0x467   : > { %v553_v27 = vsub.f32 %v549_v24, %v552_v26 }
 0x469   : > { %v554_v28 = vmul.f32 1.442695, %v553_v27 }
 0x46b   : > { %957 = vpow2.f32 %v554_v28 }
 0x46e   : > { %v637_v36 = vpop.permute.xlu0 %636 }
 0x46f   : > { %vm638_vm7 = vcmp.eq.s32.totalorder %v1337_v9, %v637_v36 }
 0x470   : > { %v863_v37 = vsel %vm638_vm7, 1.0, %v1095_v49 }
 0x475   : > { %v958_v29 = vpop.eup %957 }
 0x476   : > { %v556_v30 = vsel %vm403_vm2, %v958_v29, 0.0 }
 0x477   : > { %557 = vadd.xlane.f32.xlu1 %v556_v30 }
 0x504   : > { %v558_v33 = vpop.xlane.xlu1 %557 }
 0x505   : > { %959 = vrcp.f32 %v558_v33 }
 0x50f   : > { %v960_v34 = vpop.eup %959 }
 0x510   : > { %v560_v35 = vmul.f32 %v960_v34, %v958_v29 }
 0x512   : > { %883 = vmatmul.mubr.msk.f32.vlgmr.msra.gmra.mrb[0].mxu1 %vm403_vm2, %v560_v35 }
 0x5e5   : > { %v630_v38 = vpop.f32.mrb[0].mxu1 }
 0x5e6   : > { %v884_v39 = vpop.f32.mrb[1].mxu1  ;;  %886 = vmatpush3.msra.mxu0 %v630_v38 }
 0x5e7   : > { %888 = vmatmul.mubr.msk.f32.vlgmr.msra.gmra.mrb[2].mxu0 %vm403_vm2, %v863_v37 }
 0x6ba   : > { %v710_v9 = vpop.f32.mrb[2].mxu0 }
 0x6bb   : > { %714 = vst.msk [vmem:[%s357_s10] sm:$0xff] %vm383_vm0, %v710_v9  ;;  %v889_v40 = vpop.f32.mrb[3].mxu0 }
 0x6bc   : > { %1034 = shalt.err (!%p1031_p11)
}
 0x6bd   : > { %s1035_s23 = scalar_lea.hbm %s1420_s18, 128  ;;  %s1039_s24 = scalar_lea.hbm %s1472_s7, 256 }
 0x6be   : > { %p1036_p12 = scmp.ne.s32.totalorder %s1420_s18, %s1035_s23  ;;  %p1040_p10 = scmp.lt.u32.totalorder %s1420_s18, %s1472_s7 }
 0x6bf   : > { %p1041_p6 = scmp.lt.u32.totalorder %s1039_s24, %s1035_s23  ;;  %p1043_p3 = scmp.lt.u32.totalorder %s1035_s23, %s1420_s18 }
 0x6c0   : > { %p1037_p2 = pnand %p1036_p12, %p1485_p7 }
 0x6c1   : > { %p1042_p13 = por %p1041_p6, %p1040_p10 }
 0x6c2   : > { %p1038_p4 = pneg %p1037_p2 }
 0x6c3   : > { %p1044_p5 = por %p1043_p3, %p1042_p13 }
 0x6c5   : > { %p1045_p8 = pnand %p1044_p5, %p1038_p4 }
 0x6c7   : > { %1048 = shalt.err (!%p1045_p8)
}
 0x6c8   : > { %894 = dma.vmem_to_hbm [thread:$0]  (%p1485_p7), %s1422_s21, 128, %s1420_s18, %s716_s9  }
 0x6c9 PF: > { %s741_s10 = sand.u32 1, %s1079_s26   ;;  %p1486_p9 = scmp.ne.s32.totalorder %s1478_s15, 0 }
 0x6ca   : > { %p1487_p0 = scmp.ge.s32.totalorder %s1091_s29, 2  ;;  %s742_s20 = scalar_lea.sflag [#allocation5], %s741_s10 }
 0x6cc   : > { %p904_p1 = pnand %p1487_p0, %p1486_p9 }
 0x6ce   : > { %1074 = dma.done.wait (!%p904_p1), %s742_s20, 128  }
 0x6cf   : > { %1076 = vsyncadd (!%p904_p1), %s742_s20, 4294967168  ;;  %p24_p11 = scmp.ge.s32.totalorder %s1167_s8, 4   ;;  %s1488_s26 = smov %s1083_s27 }
 0x6d0   : > { %s1489_s27 = smov %s1087_s28  ;;  %s1490_s28 = smov %s1179_s11 }
 0x6d1   : > { %s1491_s29 = smov %s1167_s8  ;;  %26 = sbr.rel (!%p24_p11) target bundleno = 9 (0x9), region = 112 }
 0x6d8   :  { %747 = vsyncpa [#allocation4], 1 }
 0x6d9   :  { %749 = vsyncpa [#allocation4 + $0x1], 1 }
 0x6da   :  { %750 = vsyncpa [#allocation7], 1 }
 0x6db   :  { %752 = vsyncpa [#allocation7 + $0x1], 1 }
 0x6dc   :  { %753 = vsyncpa [#allocation5], 1 }
 0x6dd   :  { %755 = vsyncpa [#allocation5 + $0x1], 1 }

</bundles_post_ra>
